<compile_context>
chip_gen: v5e
topology: v5e:2x2
jax: 0.10.0
libtpu: 0.0.40
codegen_flags: <defaults>
</compile_context>

<pallas_src>
import jax
import jax.numpy as jnp
from jax.experimental import pallas as pl
from jax.experimental.pallas import tpu as pltpu

_LANE = 128   # vreg lane width
_SUB = 8      # f32 sublane multiple


def _round_up(n, m):
    return ((n + m - 1) // m) * m


def _num_tensorcores():
    """Best-effort TensorCore-per-chip count (v7x=2, v5e/v6e=1); safe fallback 1."""
    try:
        info = pltpu.get_tpu_info()
        for attr in ("num_cores", "tensorcore_count", "num_tensorcores",
                     "cores_per_chip", "core_count"):
            n = getattr(info, attr, None)
            if n:
                return int(n)
    except Exception:
        pass
    try:
        n = getattr(jax.local_devices()[0], "num_cores", None)
        if n:
            return int(n)
    except Exception:
        pass
    return 1


def _choose_tile(B, block_b_max, num_cores):
    """Pick (bm, Bp): batch tile and padded batch size."""
    Bp8 = _round_up(max(B, _SUB), _SUB)
    if num_cores <= 1 and Bp8 <= min(block_b_max, 512):
        # Single-TC chip, small batch: one tile. Weights stay resident either
        # way; splitting only adds ~0.35us/step with no parallelism to gain.
        return Bp8, Bp8
    # Multi-TC (v7x) or large batch: >=4 steps per TensorCore for DMA/compute
    # overlap, step count a multiple of the core count so no TC idles.
    target_steps = 4 * max(num_cores, 1)
    bm = _round_up(pl.cdiv(Bp8, target_steps), _SUB)
    bm = int(max(_SUB, min(block_b_max, bm)))
    steps = pl.cdiv(Bp8, bm)
    if num_cores > 1 and steps > 1 and steps % num_cores:
        steps = _round_up(steps, num_cores)
    return bm, steps * bm


def mlp_kernel(x_ref, w1_ref, b1_ref, w2_ref, b2_ref, w3_ref, b3_ref, o_ref):
    # Fused hot path: 3 MXU matmuls + 2 ReLUs on one batch tile, all in VMEM.
    # Activations are cast to the weight dtype (bf16 by default) on the VPU;
    # accumulation stays f32; biases are f32 added to f32 accumulators.
    cd = w1_ref.dtype
    x = x_ref[...].astype(cd)
    h1 = jnp.dot(x, w1_ref[...], preferred_element_type=jnp.float32) + b1_ref[...]
    h1 = jnp.maximum(h1, 0.0)
    h2 = jnp.dot(h1.astype(cd), w2_ref[...],
                 preferred_element_type=jnp.float32) + b2_ref[...]
    h2 = jnp.maximum(h2, 0.0)
    out = jnp.dot(h2.astype(cd), w3_ref[...],
                  preferred_element_type=jnp.float32) + b3_ref[...]
    o_ref[...] = out.astype(o_ref.dtype)


def prepare_params(params, *, compute_dtype=jnp.bfloat16):
    """One-time: pad hidden dim to 128 lanes and cast weights to the MXU dtype.

    Zero padding is numerically exact (ReLU(0)=0; zero rows/cols contribute
    nothing).  The output dim is NOT padded -- only valid lanes are written.
    Biases stay f32 (added to f32 accumulators in-kernel).
    """
    input_dim, hidden = params["w1"].shape
    output_dim = params["w3"].shape[1]
    Hp = _round_up(hidden, _LANE)  # 64 -> 128

    w1 = jnp.zeros((input_dim, Hp), jnp.float32).at[:, :hidden].set(params["w1"])
    b1 = jnp.zeros((1, Hp), jnp.float32).at[:, :hidden].set(params["b1"])
    w2 = jnp.zeros((Hp, Hp), jnp.float32).at[:hidden, :hidden].set(params["w2"])
    b2 = jnp.zeros((1, Hp), jnp.float32).at[:, :hidden].set(params["b2"])
    w3 = jnp.zeros((Hp, output_dim), jnp.float32).at[:hidden, :].set(params["w3"])
    b3 = params["b3"].astype(jnp.float32).reshape(1, output_dim)

    return {
        "w1": w1.astype(compute_dtype),
        "b1": b1,
        "w2": w2.astype(compute_dtype),
        "b2": b2,
        "w3": w3.astype(compute_dtype),
        "b3": b3,
    }


def policy_network_forward(x, prepared, *, block_b_max=1024, num_cores=None):
    """x: (B, input_dim) float32.  prepared: output of prepare_params()."""
    B, input_dim = x.shape
    Hp = prepared["w1"].shape[1]
    output_dim = prepared["w3"].shape[1]

    if num_cores is None:
        num_cores = _num_tensorcores()
    bm, Bp = _choose_tile(B, block_b_max, num_cores)

    pad_b = Bp - B
    if pad_b:
        x = jnp.pad(x, ((0, pad_b), (0, 0)))
    grid = (Bp // bm,)

    full = lambda i: (0, 0)  # weights/biases: same (whole) block every step

    out = pl.pallas_call(
        mlp_kernel,
        out_shape=jax.ShapeDtypeStruct((Bp, output_dim), jnp.float32),
        grid_spec=pltpu.PrefetchScalarGridSpec(
            num_scalar_prefetch=0,
            grid=grid,
            in_specs=[
                pl.BlockSpec((bm, input_dim), lambda i: (i, 0)),   # x tile (f32)
                pl.BlockSpec((input_dim, Hp), full),               # w1
                pl.BlockSpec((1, Hp), full),                       # b1
                pl.BlockSpec((Hp, Hp), full),                      # w2
                pl.BlockSpec((1, Hp), full),                       # b2
                pl.BlockSpec((Hp, output_dim), full),              # w3 (K padded only)
                pl.BlockSpec((1, output_dim), full),               # b3
            ],
            out_specs=pl.BlockSpec((bm, output_dim), lambda i: (i, 0)),
        ),
        compiler_params=pltpu.CompilerParams(
            dimension_semantics=("parallel",),
        ),
    )(x, prepared["w1"], prepared["b1"], prepared["w2"], prepared["b2"],
      prepared["w3"], prepared["b3"])

    return out[:B] if pad_b else out


def init_params(key, input_dim, hidden, output_dim):
    """Deterministic init mimicking nn.Linear's uniform(-1/sqrt(fan_in), ...)."""
    ks = jax.random.split(key, 6)

    def linear(kw, kb, fan_in, fan_out):
        bound = 1.0 / jnp.sqrt(jnp.float32(fan_in))
        # stored as (in, out) == PyTorch weight.T
        w = jax.random.uniform(kw, (fan_in, fan_out), jnp.float32, -bound, bound)
        b = jax.random.uniform(kb, (1, fan_out), jnp.float32, -bound, bound)
        return w, b

    w1, b1 = linear(ks[0], ks[1], input_dim, hidden)
    w2, b2 = linear(ks[2], ks[3], hidden, hidden)
    w3, b3 = linear(ks[4], ks[5], hidden, output_dim)
    return {"w1": w1, "b1": b1, "w2": w2, "b2": b2, "w3": w3, "b3": b3}


def _reference(x, params):
    h = jnp.maximum(x @ params["w1"] + params["b1"], 0.0)
    h = jnp.maximum(h @ params["w2"] + params["b2"], 0.0)
    return h @ params["w3"] + params["b3"]


if __name__ == "__main__":
    key = jax.random.PRNGKey(0)
    k_x, k_x2, k_p = jax.random.split(key, 3)

    batch, input_dim, hidden, output_dim = 8, 16, 64, 4
    params = init_params(k_p, input_dim, hidden, output_dim)

    # One-time parameter preparation (padding + dtype cast) outside the hot path.
    prepared_bf16 = prepare_params(params)                          # default: bf16 MXU operands
    prepared_f32 = prepare_params(params, compute_dtype=jnp.float32)

    # Small batch.
    x = jax.random.normal(k_x, (batch, input_dim), jnp.float32)
    ref = _reference(x, params)

    out_f32 = jax.block_until_ready(policy_network_forward(x, prepared_f32))
    assert out_f32.shape == (batch, output_dim)
    assert jnp.allclose(out_f32, ref, atol=1e-5, rtol=1e-5), "mismatch vs reference (f32, B=8)"

    out_bf16 = jax.block_until_ready(policy_network_forward(x, prepared_bf16))
    assert out_bf16.shape == (batch, output_dim)
    assert jnp.allclose(out_bf16, ref, atol=5e-2, rtol=5e-2), "mismatch vs reference (bf16, B=8)"

    # Larger, non-multiple-of-8 batch: exercises batch padding and the
    # multi-step / multi-core tiling path.
    x2 = jax.random.normal(k_x2, (40, input_dim), jnp.float32)
    ref2 = _reference(x2, params)
    out2 = jax.block_until_ready(policy_network_forward(x2, prepared_bf16))
    assert out2.shape == (40, output_dim)
    assert jnp.allclose(out2, ref2, atol=5e-2, rtol=5e-2), "mismatch vs reference (bf16, B=40)"

    print("KERNEL_OK")
</pallas_src>

<mosaic_0001>
module attributes {stable_mosaic.version = 11 : i64} {
  func.func @mlp_kernel(%arg0: i32, %arg1: memref<8x16xf32, #tpu.memory_space<vmem>>, %arg2: memref<16x128xf32, #tpu.memory_space<vmem>>, %arg3: memref<1x128xf32, #tpu.memory_space<vmem>>, %arg4: memref<128x128xf32, #tpu.memory_space<vmem>>, %arg5: memref<1x128xf32, #tpu.memory_space<vmem>>, %arg6: memref<128x4xf32, #tpu.memory_space<vmem>>, %arg7: memref<1x4xf32, #tpu.memory_space<vmem>>, %arg8: memref<8x4xf32, #tpu.memory_space<vmem>>) attributes {dimension_semantics = [#tpu.dimension_semantics<parallel>], iteration_bounds = array<i64: 1>, scalar_prefetch = 0 : i64, scratch_operands = 0 : i64, tpu.core_type = #tpu.core_type<tc>, window_params = [{transform_indices = @transform_0, window_bounds = array<i64: 8, 16>}, {pipeline_mode = #tpu.pipeline_mode<synchronous>, transform_indices = @transform_1, window_bounds = array<i64: 16, 128>}, {pipeline_mode = #tpu.pipeline_mode<synchronous>, transform_indices = @transform_2, window_bounds = array<i64: 1, 128>}, {pipeline_mode = #tpu.pipeline_mode<synchronous>, transform_indices = @transform_3, window_bounds = array<i64: 128, 128>}, {pipeline_mode = #tpu.pipeline_mode<synchronous>, transform_indices = @transform_4, window_bounds = array<i64: 1, 128>}, {pipeline_mode = #tpu.pipeline_mode<synchronous>, transform_indices = @transform_5, window_bounds = array<i64: 128, 4>}, {pipeline_mode = #tpu.pipeline_mode<synchronous>, transform_indices = @transform_6, window_bounds = array<i64: 1, 4>}, {transform_indices = @transform_7, window_bounds = array<i64: 8, 4>}]} {
    %c0 = arith.constant 0 : index
    %c0_0 = arith.constant 0 : index
    %0 = vector.load %arg1[%c0, %c0_0] : memref<8x16xf32, #tpu.memory_space<vmem>>, vector<8x16xf32>
    %c0_1 = arith.constant 0 : index
    %c0_2 = arith.constant 0 : index
    %1 = vector.load %arg2[%c0_1, %c0_2] : memref<16x128xf32, #tpu.memory_space<vmem>>, vector<16x128xf32>
    %cst = arith.constant dense<0.000000e+00> : vector<8x128xf32>
    %2 = tpu.matmul %0, %1, %cst {dimension_numbers = #tpu.dot_dimension_numbers<[1], [0], [0], [1], [0, 0, 1, 1], [], []>} : vector<8x16xf32>, vector<16x128xf32>, vector<8x128xf32> -> vector<8x128xf32>
    %c0_3 = arith.constant 0 : index
    %c0_4 = arith.constant 0 : index
    %3 = vector.load %arg3[%c0_3, %c0_4] : memref<1x128xf32, #tpu.memory_space<vmem>>, vector<1x128xf32>
    %4 = vector.broadcast %3 : vector<1x128xf32> to vector<8x128xf32>
    %5 = arith.addf %2, %4 : vector<8x128xf32>
    %cst_5 = arith.constant 0.000000e+00 : f32
    %6 = vector.broadcast %cst_5 : f32 to vector<8x128xf32>
    %7 = arith.maximumf %5, %6 : vector<8x128xf32>
    %c0_6 = arith.constant 0 : index
    %c0_7 = arith.constant 0 : index
    %8 = vector.load %arg4[%c0_6, %c0_7] : memref<128x128xf32, #tpu.memory_space<vmem>>, vector<128x128xf32>
    %cst_8 = arith.constant dense<0.000000e+00> : vector<8x128xf32>
    %9 = tpu.matmul %7, %8, %cst_8 {dimension_numbers = #tpu.dot_dimension_numbers<[1], [0], [0], [1], [0, 0, 1, 1], [], []>} : vector<8x128xf32>, vector<128x128xf32>, vector<8x128xf32> -> vector<8x128xf32>
    %c0_9 = arith.constant 0 : index
    %c0_10 = arith.constant 0 : index
    %10 = vector.load %arg5[%c0_9, %c0_10] : memref<1x128xf32, #tpu.memory_space<vmem>>, vector<1x128xf32>
    %11 = vector.broadcast %10 : vector<1x128xf32> to vector<8x128xf32>
    %12 = arith.addf %9, %11 : vector<8x128xf32>
    %cst_11 = arith.constant 0.000000e+00 : f32
    %13 = vector.broadcast %cst_11 : f32 to vector<8x128xf32>
    %14 = arith.maximumf %12, %13 : vector<8x128xf32>
    %c0_12 = arith.constant 0 : index
    %c0_13 = arith.constant 0 : index
    %15 = vector.load %arg6[%c0_12, %c0_13] : memref<128x4xf32, #tpu.memory_space<vmem>>, vector<128x4xf32>
    %cst_14 = arith.constant dense<0.000000e+00> : vector<8x4xf32>
    %16 = tpu.matmul %14, %15, %cst_14 {dimension_numbers = #tpu.dot_dimension_numbers<[1], [0], [0], [1], [0, 0, 1, 1], [], []>} : vector<8x128xf32>, vector<128x4xf32>, vector<8x4xf32> -> vector<8x4xf32>
    %c0_15 = arith.constant 0 : index
    %c0_16 = arith.constant 0 : index
    %17 = vector.load %arg7[%c0_15, %c0_16] : memref<1x4xf32, #tpu.memory_space<vmem>>, vector<1x4xf32>
    %18 = vector.broadcast %17 : vector<1x4xf32> to vector<8x4xf32>
    %19 = arith.addf %16, %18 : vector<8x4xf32>
    %c0_17 = arith.constant 0 : index
    %c0_18 = arith.constant 0 : index
    %20 = vector.load %arg8[%c0_17, %c0_18] : memref<8x4xf32, #tpu.memory_space<vmem>>, vector<8x4xf32>
    tpu.vector_store %arg8[%c0_17, %c0_18], %19 {strides = array<i32>} : memref<8x4xf32, #tpu.memory_space<vmem>>, vector<8x4xf32>,
    return
  }
  func.func @transform_0(%arg0: i32) -> (i32, i32) {
    %c0_i32 = arith.constant 0 : i32
    %c0_i32_0 = arith.constant 0 : i32
    return %arg0, %c0_i32 : i32, i32
  }
  func.func @transform_1(%arg0: i32) -> (i32, i32) {
    %c0_i32 = arith.constant 0 : i32
    %c0_i32_0 = arith.constant 0 : i32
    %c0_i32_1 = arith.constant 0 : i32
    return %c0_i32, %c0_i32_0 : i32, i32
  }
  func.func @transform_2(%arg0: i32) -> (i32, i32) {
    %c0_i32 = arith.constant 0 : i32
    %c0_i32_0 = arith.constant 0 : i32
    %c0_i32_1 = arith.constant 0 : i32
    return %c0_i32, %c0_i32_0 : i32, i32
  }
  func.func @transform_3(%arg0: i32) -> (i32, i32) {
    %c0_i32 = arith.constant 0 : i32
    %c0_i32_0 = arith.constant 0 : i32
    %c0_i32_1 = arith.constant 0 : i32
    return %c0_i32, %c0_i32_0 : i32, i32
  }
  func.func @transform_4(%arg0: i32) -> (i32, i32) {
    %c0_i32 = arith.constant 0 : i32
    %c0_i32_0 = arith.constant 0 : i32
    %c0_i32_1 = arith.constant 0 : i32
    return %c0_i32, %c0_i32_0 : i32, i32
  }
  func.func @transform_5(%arg0: i32) -> (i32, i32) {
    %c0_i32 = arith.constant 0 : i32
    %c0_i32_0 = arith.constant 0 : i32
    %c0_i32_1 = arith.constant 0 : i32
    return %c0_i32, %c0_i32_0 : i32, i32
  }
  func.func @transform_6(%arg0: i32) -> (i32, i32) {
    %c0_i32 = arith.constant 0 : i32
    %c0_i32_0 = arith.constant 0 : i32
    %c0_i32_1 = arith.constant 0 : i32
    return %c0_i32, %c0_i32_0 : i32, i32
  }
  func.func @transform_7(%arg0: i32) -> (i32, i32) {
    %c0_i32 = arith.constant 0 : i32
    %c0_i32_0 = arith.constant 0 : i32
    return %arg0, %c0_i32 : i32, i32
  }
}

</mosaic_0001>

<bundles_post_ra>
// kernel: tpu_custom_call.1
= control target key start
LH: loop header
LB: loop body
LE: loop exit
PB: predicated region body
PF: predicated region fallthrough
CT: control target
= control target key end

     0   :  { %12 = vsyncpa [#allocation3], 0  ;;  %s395_s0 = inlined_call_operand.hbm [shape: f32[8,16], index: 0, kind: input, shape index: {}]   ;;  %s396_s1 = inlined_call_operand.hbm [shape: f32[16,128], index: 1, kind: input, shape index: {}]   ;;  %s397_s2 = inlined_call_operand.vmem [shape: f32[1,128], index: 2, kind: input, shape index: {}]   ;;  %s398_s3 = inlined_call_operand.vmem [shape: f32[128,128], index: 3, kind: input, shape index: {}]   ;;  %s399_s4 = inlined_call_operand.vmem [shape: f32[1,128], index: 4, kind: input, shape index: {}]   ;;  %s400_s5 = inlined_call_operand.vmem [shape: f32[128,4], index: 5, kind: input, shape index: {}]   ;;  %s401_s6 = inlined_call_operand.vmem [shape: f32[1,4], index: 6, kind: input, shape index: {}]   ;;  %s402_s7 = inlined_call_operand.vmem [shape: f32[8,4], index: 7, kind: output, shape index: {}]  }
   0x1   :  { %s19_s26 = sshll.u32 %s395_s0, 4  ;;  %s20_s26 = int_to_ptr.hbm [resolvable:$true] %s19_s26 }
   0x2   :  { %13 = vsyncpa [#allocation5], 0  ;;  %s237_s27 = smov [#allocation2]   ;;  %s29_s8 = sshll.u32 %s396_s1, 4  ;;  %s30_s8 = int_to_ptr.hbm [resolvable:$true] %s29_s8 }
   0x3   :  { %s21_s28 = sshll.u32 %s237_s27, 4  ;;  %s238_s9 = smov [#allocation4]   ;;  %s22_s28 = int_to_ptr.vmem [resolvable:$true] %s21_s28 }
   0x4   :  { %24 = dma.hbm_to_vmem [thread:$0]  %s20_s26, 128, %s22_s28, [#allocation3]  }
   0x5   :  { %s31_s10 = sshll.u32 %s238_s9, 4  ;;  %s239_s11 = smov 128   ;;  %s32_s10 = int_to_ptr.vmem [resolvable:$true] %s31_s10 }
   0x6   :  { %s240_s12 = smov 8  }
   0x7   :  { %37 = dma.hbm_to_vmem [thread:$0]  %s30_s8, 256, %s32_s10, [#allocation5], %s239_s11, %s239_s11, %s240_s12  }
   0x8   :  { %233 = dma.done.wait [#allocation3], 128  }
   0x9   :  { %234 = vsyncadd [#allocation3], 4294967168 }
   0xa   :  { %235 = dma.done.wait [#allocation5], 256  }
   0xb   :  { %236 = vsyncadd [#allocation5], 4294967040  ;;  %v58_v0 = vld [vmem:[#allocation4 + $0x8] sm:$0xff]  ;;  %v57_v1 = vld [vmem:[#allocation4] sm:$0xff]  ;;  %vm63_vm0 = vcmask 130048   ;;  %vm169_vm1 = vcmask 31744  }
   0xc   :  { %81 = vmatpush.msra.mxu0 %v58_v0  ;;  %v56_v2 = vld [vmem:[#allocation2] sm:$0xff]  ;;  %v103_v3 = vld [vmem:[%s398_s3 + $0x78] sm:$0xff]  ;;  %v102_v4 = vld [vmem:[%s398_s3 + $0x70] sm:$0xff] }
   0xd   :  { %108 = vmatpush.msra.mxu1 %v103_v3  ;;  %v101_v5 = vld [vmem:[%s398_s3 + $0x68] sm:$0xff]  ;;  %v100_v6 = vld [vmem:[%s398_s3 + $0x60] sm:$0xff]  ;;  %v99_v7 = vld [vmem:[%s398_s3 + $0x58] sm:$0xff] }
   0xe   :  { %82 = vmatpush.msra.mxu0 %v57_v1  ;;  %v98_v8 = vld [vmem:[%s398_s3 + $0x50] sm:$0xff]  ;;  %v97_v9 = vld [vmem:[%s398_s3 + $0x48] sm:$0xff]  ;;  %v96_v10 = vld [vmem:[%s398_s3 + $0x40] sm:$0xff] }
   0xf   :  { %177 = vmatmul.msk.f32.vlgmr.msra.gmra.mxu0 %vm63_vm0, %v56_v2  ;;  %109 = vmatpush.msra.mxu1 %v102_v4  ;;  %v95_v11 = vld [vmem:[%s398_s3 + $0x38] sm:$0xff]  ;;  %v94_v12 = vld [vmem:[%s398_s3 + $0x30] sm:$0xff]  ;;  %v93_v13 = vld [vmem:[%s398_s3 + $0x28] sm:$0xff] }
  0x10   :  { %v92_v14 = vld [vmem:[%s398_s3 + $0x20] sm:$0xff]  ;;  %v91_v15 = vld [vmem:[%s398_s3 + $0x18] sm:$0xff]  ;;  %v90_v16 = vld [vmem:[%s398_s3 + $0x10] sm:$0xff] }
  0x11   :  { %110 = vmatpush.msra.mxu1 %v101_v5  ;;  %v89_v17 = vld [vmem:[%s398_s3 + $0x8] sm:$0xff]  ;;  %v88_v18 = vld [vmem:[%s398_s3] sm:$0xff]  ;;  %v144_v19 = vld [vmem:[%s400_s5 + $0x78] sm:$0xff] }
  0x12   :  { %v143_v20 = vld [vmem:[%s400_s5 + $0x70] sm:$0xff]  ;;  %149 = vmatpush.msra.mxu2 %v144_v19  ;;  %v142_v21 = vld [vmem:[%s400_s5 + $0x68] sm:$0xff]  ;;  %v141_v22 = vld [vmem:[%s400_s5 + $0x60] sm:$0xff] }
  0x13   :  { %111 = vmatpush.msra.mxu1 %v100_v6  ;;  %v140_v23 = vld [vmem:[%s400_s5 + $0x58] sm:$0xff]  ;;  %v139_v24 = vld [vmem:[%s400_s5 + $0x50] sm:$0xff]  ;;  %v138_v25 = vld [vmem:[%s400_s5 + $0x48] sm:$0xff] }
  0x14   :  { %150 = vmatpush.msra.mxu2 %v143_v20  ;;  %v137_v26 = vld [vmem:[%s400_s5 + $0x40] sm:$0xff]  ;;  %v136_v27 = vld [vmem:[%s400_s5 + $0x38] sm:$0xff]  ;;  %v135_v28 = vld [vmem:[%s400_s5 + $0x30] sm:$0xff] }
  0x15   :  { %112 = vmatpush.msra.mxu1 %v99_v7  ;;  %v134_v29 = vld [vmem:[%s400_s5 + $0x28] sm:$0xff]  ;;  %v133_v30 = vld [vmem:[%s400_s5 + $0x20] sm:$0xff]  ;;  %v132_v31 = vld [vmem:[%s400_s5 + $0x18] sm:$0xff] }
  0x16   :  { %151 = vmatpush.msra.mxu2 %v142_v21  ;;  %v182_v32 = vld [vmem:[%s397_s2] ss:$0 sm:$0xff]  ;;  %v131_v36 = vld [vmem:[%s400_s5 + $0x10] sm:$0xff]  ;;  %v130_v37 = vld [vmem:[%s400_s5 + $0x8] sm:$0xff] }
  0x17   :  { %113 = vmatpush.msra.mxu1 %v98_v8  ;;  %v129_v38 = vld [vmem:[%s400_s5] sm:$0xff] }
  0x18   :  { %152 = vmatpush.msra.mxu2 %v141_v22  ;;  %v183_v39 = vld [vmem:[%s399_s4] ss:$0 sm:$0xff] }
  0x19   :  { %114 = vmatpush.msra.mxu1 %v97_v9  ;;  %v184_v43 = vld [vmem:[%s401_s6] ss:$0 sm:$0xff] }
  0x1a   :  { %153 = vmatpush.msra.mxu2 %v140_v23 }
  0x1b   :  { %115 = vmatpush.msra.mxu1 %v96_v10 }
  0x1c   :  { %154 = vmatpush.msra.mxu2 %v139_v24 }
  0x1d   :  { %116 = vmatpush.msra.mxu1 %v95_v11 }
  0x1e   :  { %155 = vmatpush.msra.mxu2 %v138_v25 }
  0x1f   :  { %117 = vmatpush.msra.mxu1 %v94_v12 }
  0x20   :  { %156 = vmatpush.msra.mxu2 %v137_v26 }
  0x21   :  { %118 = vmatpush.msra.mxu1 %v93_v13 }
  0x22   :  { %157 = vmatpush.msra.mxu2 %v136_v27 }
  0x23   :  { %119 = vmatpush.msra.mxu1 %v92_v14 }
  0x24   :  { %158 = vmatpush.msra.mxu2 %v135_v28 }
  0x25   :  { %120 = vmatpush.msra.mxu1 %v91_v15 }
  0x26   :  { %159 = vmatpush.msra.mxu2 %v134_v29 }
  0x27   :  { %121 = vmatpush.msra.mxu1 %v90_v16 }
  0x28   :  { %160 = vmatpush.msra.mxu2 %v133_v30 }
  0x29   :  { %122 = vmatpush.msra.mxu1 %v89_v17 }
  0x2a   :  { %161 = vmatpush.msra.mxu2 %v132_v31 }
  0x2b   :  { %123 = vmatpush.msra.mxu1 %v88_v18 }
  0x2c   :  { %162 = vmatpush.msra.mxu2 %v131_v36 }
  0x2e   :  { %163 = vmatpush.msra.mxu2 %v130_v37 }
  0x30   :  { %164 = vmatpush.msra.mxu2 %v129_v38 }
  0x8c   :  { %v84_v33 = vpop.f32.mrf.mxu0 }
  0x8d   :  { %v85_v34 = vadd.f32 %v182_v32, %v84_v33 }
  0x8f   :  { %v87_v35 = vmax.f32 %v85_v34, 0.0 }
  0x91   :  { %124 = vmatmul.f32.vlgmr.msra.gmra.mxu1 %v87_v35 }
 0x10e   :  { %v125_v40 = vpop.f32.mrf.mxu1 }
 0x10f   :  { %v126_v41 = vadd.f32 %v183_v39, %v125_v40 }
 0x111   :  { %v128_v42 = vmax.f32 %v126_v41, 0.0 }
 0x113   :  { %165 = vmatmul.f32.vlgmr.msra.gmra.mxu2 %v128_v42 }
 0x196   :  { %v166_v44 = vpop.f32.mrf.mxu2 }
 0x197   :  { %v167_v45 = vadd.f32 %v184_v43, %v166_v44 }
 0x199   :  { %170 = vst.msk [vmem:[%s402_s7] sm:$0xff] %vm169_vm1, %v167_v45 }
 0x19a   :  { %175 = vsyncpa [#allocation3], 1 }
 0x19b   :  { %176 = vsyncpa [#allocation5], 1 }

</bundles_post_ra>
